<compile_context>
chip_gen: v6e
topology: v6e:2x2x1
jax: 0.10.0
libtpu: 0.0.40
codegen_flags: <defaults>
</compile_context>

<pallas_src>
import jax
import jax.numpy as jnp
from jax import lax
from jax.experimental import pallas as pl
from jax.experimental.pallas import tpu as pltpu


def _round_up(x, m):
    return ((x + m - 1) // m) * m


def _fused_linear_sub_kernel(x_ref, x2_ref, w_ref, b_ref, o_ref):
    # x_ref : (Bp, Kp)   concatenated [x1 | x2], zero-padded
    # x2_ref: (Bp, Np)   x2, zero-padded
    # w_ref : (Np, Kp)   PyTorch (out, in) weight, zero-padded
    # b_ref : (1, Np)    bias, zero-padded
    x = x_ref[...]
    w = w_ref[...]
    # Single MXU push: contract x's dim 1 with w's dim 1 (i.e. x @ w.T in layout).
    v = lax.dot_general(
        x, w,
        dimension_numbers=(((1,), (1,)), ((), ())),
        preferred_element_type=jnp.float32,
    )
    o_ref[...] = (v + b_ref[...] - x2_ref[...]).astype(o_ref.dtype)


def fused_linear_sub(x1, x2, weight, bias):
    """x1, x2: (B, F) float32.  weight: (F, 2F) (PyTorch (out, in)).  bias: (F,)."""
    B, F = x1.shape
    K = 2 * F
    assert weight.shape == (F, K) and bias.shape == (F,)

    # Lane/sublane-dense, MXU-edge-aligned padded shapes.
    Bp = _round_up(B, 8)      # f32 sublane multiple
    Kp = _round_up(K, 128)    # contraction dim -> full MXU edge
    Np = _round_up(F, 128)    # output lanes -> unmasked vst

    # Wrapper-side glue (fused by XLA): concat once, zero-pad everything.
    x_cat = jnp.concatenate([x1, x2], axis=1)                  # (B, 2F)
    x_pad = jnp.pad(x_cat, ((0, Bp - B), (0, Kp - K)))
    x2_pad = jnp.pad(x2, ((0, Bp - B), (0, Np - F)))
    w_pad = jnp.pad(weight, ((0, Np - F), (0, Kp - K)))        # (Np, Kp)
    b_pad = jnp.pad(bias.reshape(1, F), ((0, 0), (0, Np - F))) # (1, Np)

    vmem = pltpu.MemorySpace.VMEM
    out_pad = pl.pallas_call(
        _fused_linear_sub_kernel,
        out_shape=jax.ShapeDtypeStruct((Bp, Np), x1.dtype),
        in_specs=[
            pl.BlockSpec((Bp, Kp), lambda: (0, 0), memory_space=vmem),
            pl.BlockSpec((Bp, Np), lambda: (0, 0), memory_space=vmem),
            pl.BlockSpec((Np, Kp), lambda: (0, 0), memory_space=vmem),
            pl.BlockSpec((1, Np), lambda: (0, 0), memory_space=vmem),
        ],
        out_specs=pl.BlockSpec((Bp, Np), lambda: (0, 0), memory_space=vmem),
    )(x_pad, x2_pad, w_pad, b_pad)

    # Padded rows/cols are exact zeros in the inputs, so the valid region is exact.
    return out_pad[:B, :F]


if __name__ == "__main__":
    key = jax.random.PRNGKey(0)
    k1, k2, kw, kb = jax.random.split(key, 4)

    B, F = 2, 32
    x1 = jax.random.normal(k1, (B, F), dtype=jnp.float32)
    x2 = jax.random.normal(k2, (B, F), dtype=jnp.float32)

    # Deterministic nn.Linear(64, 32)-style init: U(-1/sqrt(in), 1/sqrt(in))
    in_features = 2 * F
    bound = 1.0 / jnp.sqrt(jnp.float32(in_features))
    weight = jax.random.uniform(kw, (F, in_features), jnp.float32, -bound, bound)
    bias = jax.random.uniform(kb, (F,), jnp.float32, -bound, bound)

    out = jax.jit(fused_linear_sub)(x1, x2, weight, bias)
    jax.block_until_ready(out)

    # Pure-JAX reference check (cat -> linear -> subtract)
    ref = jnp.concatenate([x1, x2], axis=1) @ weight.T + bias - x2
    assert out.shape == (B, F)
    assert jnp.allclose(out, ref, atol=1e-5, rtol=1e-5)

    print("KERNEL_OK")
</pallas_src>

<mosaic_0001>
module attributes {stable_mosaic.version = 11 : i64} {
  func.func @_fused_linear_sub_kernel(%arg0: memref<8x128xf32, #tpu.memory_space<vmem>>, %arg1: memref<8x128xf32, #tpu.memory_space<vmem>>, %arg2: memref<128x128xf32, #tpu.memory_space<vmem>>, %arg3: memref<1x128xf32, #tpu.memory_space<vmem>>, %arg4: memref<8x128xf32, #tpu.memory_space<vmem>>) attributes {dimension_semantics = [], scalar_prefetch = 0 : i64, scratch_operands = 0 : i64, tpu.core_type = #tpu.core_type<tc>} {
    %c0 = arith.constant 0 : index
    %c0_0 = arith.constant 0 : index
    %0 = vector.load %arg0[%c0, %c0_0] : memref<8x128xf32, #tpu.memory_space<vmem>>, vector<8x128xf32>
    %c0_1 = arith.constant 0 : index
    %c0_2 = arith.constant 0 : index
    %1 = vector.load %arg2[%c0_1, %c0_2] : memref<128x128xf32, #tpu.memory_space<vmem>>, vector<128x128xf32>
    %cst = arith.constant dense<0.000000e+00> : vector<8x128xf32>
    %2 = tpu.matmul %0, %1, %cst {dimension_numbers = #tpu.dot_dimension_numbers<[1], [1], [0], [0], [0, 0, 1, 0], [], []>} : vector<8x128xf32>, vector<128x128xf32>, vector<8x128xf32> -> vector<8x128xf32>
    %c0_3 = arith.constant 0 : index
    %c0_4 = arith.constant 0 : index
    %3 = vector.load %arg3[%c0_3, %c0_4] : memref<1x128xf32, #tpu.memory_space<vmem>>, vector<1x128xf32>
    %4 = vector.broadcast %3 : vector<1x128xf32> to vector<8x128xf32>
    %5 = arith.addf %2, %4 : vector<8x128xf32>
    %c0_5 = arith.constant 0 : index
    %c0_6 = arith.constant 0 : index
    %6 = vector.load %arg1[%c0_5, %c0_6] : memref<8x128xf32, #tpu.memory_space<vmem>>, vector<8x128xf32>
    %7 = arith.subf %5, %6 : vector<8x128xf32>
    %c0_7 = arith.constant 0 : index
    %c0_8 = arith.constant 0 : index
    %8 = vector.load %arg4[%c0_7, %c0_8] : memref<8x128xf32, #tpu.memory_space<vmem>>, vector<8x128xf32>
    tpu.vector_store %arg4[%c0_7, %c0_8], %7 {strides = array<i32>} : memref<8x128xf32, #tpu.memory_space<vmem>>, vector<8x128xf32>,
    return
  }
}

</mosaic_0001>

<bundles_post_ra>
// kernel: fused_linear_sub.1
= control target key start
LH: loop header
LB: loop body
LE: loop exit
PB: predicated region body
PF: predicated region fallthrough
CT: control target
= control target key end

     0   :  { %v173_v0 = vmov 0.0   ;;  %vm174_vm0 = vmmov 0   ;;  %s260_s2 = inlined_call_operand.vmem [shape: f32[128,128], index: 2, kind: input, shape index: {}]   ;;  %s261_s0 = inlined_call_operand.vmem [shape: f32[8,128], index: 0, kind: input, shape index: {}]   ;;  %s262_s3 = inlined_call_operand.vmem [shape: f32[1,128], index: 3, kind: input, shape index: {}]   ;;  %s263_s1 = inlined_call_operand.vmem [shape: f32[8,128], index: 1, kind: input, shape index: {}]   ;;  %s264_s4 = inlined_call_operand.vmem [shape: f32[8,128], index: 4, kind: output, shape index: {}]  }
   0x1   :  { %136 = vmatprep.subr.mxu0 %v173_v0  ;;  %v33_v1 = vld [vmem:[%s260_s2 + $0x78] sm:$0xff]  ;;  %168 = vmatprep.mubr.msk.f32.mxu0 %vm174_vm0, %v173_v0  ;;  %v32_v2 = vld [vmem:[%s260_s2 + $0x70] sm:$0xff]  ;;  %v31_v3 = vld [vmem:[%s260_s2 + $0x68] sm:$0xff] }
   0x2   :  { %137 = vmatpush3.xpose.msra.mxu0 %v33_v1  ;;  %v30_v4 = vld [vmem:[%s260_s2 + $0x60] sm:$0xff]  ;;  %v29_v5 = vld [vmem:[%s260_s2 + $0x58] sm:$0xff]  ;;  %v28_v6 = vld [vmem:[%s260_s2 + $0x50] sm:$0xff] }
   0x3   :  { %138 = vmatprep.subr.mxu0 %v173_v0  ;;  %v27_v7 = vld [vmem:[%s260_s2 + $0x48] sm:$0xff]  ;;  %v26_v8 = vld [vmem:[%s260_s2 + $0x40] sm:$0xff]  ;;  %v25_v9 = vld [vmem:[%s260_s2 + $0x38] sm:$0xff] }
   0x4   :  { %v24_v10 = vld [vmem:[%s260_s2 + $0x30] sm:$0xff]  ;;  %v23_v11 = vld [vmem:[%s260_s2 + $0x28] sm:$0xff]  ;;  %v22_v12 = vld [vmem:[%s260_s2 + $0x20] sm:$0xff] }
   0x5   :  { %v21_v13 = vld [vmem:[%s260_s2 + $0x18] sm:$0xff]  ;;  %v20_v14 = vld [vmem:[%s260_s2 + $0x10] sm:$0xff]  ;;  %v19_v15 = vld [vmem:[%s260_s2 + $0x8] sm:$0xff] }
   0x6   :  { %139 = vmatpush3.xpose.msra.mxu0 %v32_v2  ;;  %v18_v16 = vld [vmem:[%s260_s2] sm:$0xff] }
   0x7   :  { %140 = vmatprep.subr.mxu0 %v173_v0  ;;  %v17_v17 = vld [vmem:[%s261_s0] sm:$0xff] }
   0x8   :  { %v118_v18 = vld [vmem:[%s262_s3] ss:$0 sm:$0xff] }
   0x9   :  { %v111_v20 = vld [vmem:[%s263_s1] sm:$0xff] }
   0xa   :  { %141 = vmatpush3.xpose.msra.mxu0 %v31_v3 }
   0xb   :  { %142 = vmatprep.subr.mxu0 %v173_v0 }
   0xe   :  { %143 = vmatpush3.xpose.msra.mxu0 %v30_v4 }
   0xf   :  { %144 = vmatprep.subr.mxu0 %v173_v0 }
  0x12   :  { %145 = vmatpush3.xpose.msra.mxu0 %v29_v5 }
  0x13   :  { %146 = vmatprep.subr.mxu0 %v173_v0 }
  0x16   :  { %147 = vmatpush3.xpose.msra.mxu0 %v28_v6 }
  0x17   :  { %148 = vmatprep.subr.mxu0 %v173_v0 }
  0x1a   :  { %149 = vmatpush3.xpose.msra.mxu0 %v27_v7 }
  0x1b   :  { %150 = vmatprep.subr.mxu0 %v173_v0 }
  0x1e   :  { %151 = vmatpush3.xpose.msra.mxu0 %v26_v8 }
  0x1f   :  { %152 = vmatprep.subr.mxu0 %v173_v0 }
  0x22   :  { %153 = vmatpush3.xpose.msra.mxu0 %v25_v9 }
  0x23   :  { %154 = vmatprep.subr.mxu0 %v173_v0 }
  0x26   :  { %155 = vmatpush3.xpose.msra.mxu0 %v24_v10 }
  0x27   :  { %156 = vmatprep.subr.mxu0 %v173_v0 }
  0x2a   :  { %157 = vmatpush3.xpose.msra.mxu0 %v23_v11 }
  0x2b   :  { %158 = vmatprep.subr.mxu0 %v173_v0 }
  0x2e   :  { %159 = vmatpush3.xpose.msra.mxu0 %v22_v12 }
  0x2f   :  { %160 = vmatprep.subr.mxu0 %v173_v0 }
  0x32   :  { %161 = vmatpush3.xpose.msra.mxu0 %v21_v13 }
  0x33   :  { %162 = vmatprep.subr.mxu0 %v173_v0 }
  0x36   :  { %163 = vmatpush3.xpose.msra.mxu0 %v20_v14 }
  0x37   :  { %164 = vmatprep.subr.mxu0 %v173_v0 }
  0x3a   :  { %165 = vmatpush3.xpose.msra.mxu0 %v19_v15 }
  0x3b   :  { %166 = vmatprep.subr.mxu0 %v173_v0 }
  0x3e   :  { %167 = vmatpush3.xpose.msra.mxu0 %v18_v16 }
  0x41   :  { %169 = vmatmul.mubr.f32.vlgmr.msra.gmra.mxu0 %v17_v17 }
 0x101   :  { %v107_v19 = vpop.f32.mrf.mxu0 }
 0x102   :  { %v108_v21 = vadd.f32 %v118_v18, %v107_v19 }
 0x103   :  { %v170_v22 = vpop.f32.mrf.mxu0 }
 0x104   :  { %v112_v23 = vsub.f32 %v108_v21, %v111_v20 }
 0x106   :  { %113 = vst [vmem:[%s264_s4] sm:$0xff] %v112_v23 }

</bundles_post_ra>
